<compile_context>
chip_gen: v7x
topology: tpu7x:2x2x1
jax: 0.10.0
libtpu: 0.0.40
codegen_flags: <defaults>
</compile_context>

<pallas_src>
import functools

import jax
import jax.numpy as jnp
from jax import lax
from jax.experimental import pallas as pl
from jax.experimental.pallas import tpu as pltpu


def _round_up(x: int, m: int) -> int:
    return (x + m - 1) // m * m


def _gram_kernel(fa_ref, fb_ref, g_ref, acc_ref, *, inv_denom: float):
    k = pl.program_id(2)

    @pl.when(k == 0)
    def _():
        acc_ref[...] = jnp.zeros_like(acc_ref)

    # F_i @ F_j^T via dot_general contracting both operands on their K (lane)
    # axis -- feeds the MXU directly, no transposed copy of the tile.
    acc_ref[...] += lax.dot_general(
        fa_ref[...],
        fb_ref[...],
        dimension_numbers=(((1,), (1,)), ((), ())),
        preferred_element_type=jnp.float32,
    )

    @pl.when(k == pl.num_programs(2) - 1)
    def _():
        g_ref[...] = acc_ref[...] * inv_denom


def gram_matrix_pallas(x, *, tk_max: int = 1024, tm_max: int = 256):
    """G = (F @ F^T) / (a*b*c*d) with F = x.reshape(a*b, c*d), via Pallas."""
    a, b, c, d = x.shape
    M, K = a * b, c * d
    denom = float(a * b * c * d)

    # ---- tiling ----
    # Output (M, M): keep a single block when small (block == full dims is
    # always legal), otherwise tile with tm_max-wide lane-dense blocks and
    # expose two parallel grid axes.
    if M <= 512:
        Mp = _round_up(M, 8)
        tm = Mp
    else:
        tm = tm_max
        Mp = _round_up(M, tm)

    # Reduction K: pad to a lane multiple; do it in one big step when it fits,
    # otherwise use tk_max-wide tiles (zero-padding K is harmless for F@F^T).
    Kp = _round_up(K, 128)
    if Kp <= tk_max:
        tk = Kp
    else:
        tk = tk_max
        Kp = _round_up(Kp, tk)

    f = x.reshape(M, K).astype(jnp.float32)
    if (Mp, Kp) != (M, K):
        f = jnp.pad(f, ((0, Mp - M), (0, Kp - K)))

    grid = (Mp // tm, Mp // tm, Kp // tk)
    kernel = functools.partial(_gram_kernel, inv_denom=1.0 / denom)

    # VMEM budget: 2 inputs x 2 buffers of (tm, tk) + double-buffered (tm, tm)
    # output + (tm, tm) accumulator scratch, plus headroom.
    vmem_limit = (2 * 2 * tm * tk * 4) + (2 * tm * tm * 4) + (tm * tm * 4) + (4 << 20)
    vmem_limit = min(max(vmem_limit, 8 << 20), 48 << 20)

    g_padded = pl.pallas_call(
        kernel,
        out_shape=jax.ShapeDtypeStruct((Mp, Mp), jnp.float32),
        grid_spec=pltpu.PrefetchScalarGridSpec(
            num_scalar_prefetch=0,
            grid=grid,
            in_specs=[
                pl.BlockSpec((tm, tk), lambda i, j, k: (i, k)),
                pl.BlockSpec((tm, tk), lambda i, j, k: (j, k)),
            ],
            out_specs=pl.BlockSpec((tm, tm), lambda i, j, k: (i, j)),
            scratch_shapes=[pltpu.VMEM((tm, tm), jnp.float32)],
        ),
        compiler_params=pltpu.CompilerParams(
            dimension_semantics=("parallel", "parallel", "arbitrary"),
            vmem_limit_bytes=vmem_limit,
        ),
    )(f, f)

    if Mp != M:
        g_padded = g_padded[:M, :M]  # drop zero-padded rows/cols before MSE
    return g_padded


class StyleLossPallas:
    """JAX/Pallas equivalent of the PyTorch StyleLoss module."""

    def __init__(self, target_feature):
        # Gram-only path at init: no zeros-target DMA, no pointless reduction.
        self.target = jax.block_until_ready(gram_matrix_pallas(target_feature))
        self.loss = None

    def __call__(self, x):
        G = gram_matrix_pallas(x)
        # MSE over (M, M) is tiny and memory-bound -> plain XLA reduction on
        # the Pallas-produced G (keeps the hot pipeline free of the target).
        self.loss = jnp.mean((G - self.target) ** 2)
        return x  # forward returns the input unchanged ("transparent" layer)


if __name__ == "__main__":
    key = jax.random.PRNGKey(0)
    k1, k2 = jax.random.split(key)
    # NCHW, small shapes consistent with the module.
    target_feature = jax.random.normal(k1, (2, 4, 16, 16), dtype=jnp.float32)
    x = jax.random.normal(k2, (2, 4, 16, 16), dtype=jnp.float32)

    module = StyleLossPallas(target_feature)
    out = jax.block_until_ready(module(x))
    loss = jax.block_until_ready(module.loss)

    # Pure-JAX reference check.
    def gram_ref(v):
        a, b, c, d = v.shape
        f = v.reshape(a * b, c * d)
        return (f @ f.T) / (a * b * c * d)

    G_ref_t = gram_ref(target_feature)
    G_ref_x = gram_ref(x)
    loss_ref = jnp.mean((G_ref_x - G_ref_t) ** 2)

    assert jnp.allclose(out, x)
    assert jnp.allclose(module.target, G_ref_t, atol=1e-5, rtol=1e-5)
    assert jnp.allclose(loss, loss_ref, atol=1e-5, rtol=1e-5)

    print("KERNEL_OK")
</pallas_src>

<mosaic_0001>
module attributes {stable_mosaic.version = 11 : i64} {
  func.func @_gram_kernel(%arg0: i32, %arg1: i32, %arg2: i32, %arg3: memref<8x256xf32, #tpu.memory_space<vmem>>, %arg4: memref<8x256xf32, #tpu.memory_space<vmem>>, %arg5: memref<8x8xf32, #tpu.memory_space<vmem>>, %arg6: memref<8x8xf32, #tpu.memory_space<vmem>>) attributes {dimension_semantics = [#tpu.dimension_semantics<parallel>, #tpu.dimension_semantics<parallel>, #tpu.dimension_semantics<arbitrary>], iteration_bounds = array<i64: 1, 1, 1>, scalar_prefetch = 0 : i64, scratch_operands = 1 : i64, tpu.core_type = #tpu.core_type<tc>, window_params = [{transform_indices = @transform_0, window_bounds = array<i64: 8, 256>}, {transform_indices = @transform_1, window_bounds = array<i64: 8, 256>}, {transform_indices = @transform_2, window_bounds = array<i64: 8, 8>}]} {
    %c0_i32 = arith.constant 0 : i32
    %0 = arith.cmpi eq, %arg2, %c0_i32 : i32
    %1 = arith.extui %0 : i1 to i32
    %c0_i32_0 = arith.constant 0 : i32
    %2 = arith.cmpi ne, %1, %c0_i32_0 : i32
    scf.if %2 {
      %cst_10 = arith.constant 0.000000e+00 : f32
      %12 = vector.broadcast %cst_10 : f32 to vector<8x8xf32>
      %c0_11 = arith.constant 0 : index
      %c0_12 = arith.constant 0 : index
      %13 = vector.load %arg6[%c0_11, %c0_12] : memref<8x8xf32, #tpu.memory_space<vmem>>, vector<8x8xf32>
      tpu.vector_store %arg6[%c0_11, %c0_12], %12 {strides = array<i32>} : memref<8x8xf32, #tpu.memory_space<vmem>>, vector<8x8xf32>,
    } else {
    }
    %c0 = arith.constant 0 : index
    %c0_1 = arith.constant 0 : index
    %3 = vector.load %arg6[%c0, %c0_1] : memref<8x8xf32, #tpu.memory_space<vmem>>, vector<8x8xf32>
    %c0_2 = arith.constant 0 : index
    %c0_3 = arith.constant 0 : index
    %4 = vector.load %arg3[%c0_2, %c0_3] : memref<8x256xf32, #tpu.memory_space<vmem>>, vector<8x256xf32>
    %c0_4 = arith.constant 0 : index
    %c0_5 = arith.constant 0 : index
    %5 = vector.load %arg4[%c0_4, %c0_5] : memref<8x256xf32, #tpu.memory_space<vmem>>, vector<8x256xf32>
    %cst = arith.constant dense<0.000000e+00> : vector<8x8xf32>
    %6 = tpu.matmul %4, %5, %cst {dimension_numbers = #tpu.dot_dimension_numbers<[1], [1], [0], [0], [0, 0, 1, 0], [], []>} : vector<8x256xf32>, vector<8x256xf32>, vector<8x8xf32> -> vector<8x8xf32>
    %7 = arith.addf %3, %6 : vector<8x8xf32>
    %c0_6 = arith.constant 0 : index
    %c0_7 = arith.constant 0 : index
    %8 = vector.load %arg6[%c0_6, %c0_7] : memref<8x8xf32, #tpu.memory_space<vmem>>, vector<8x8xf32>
    tpu.vector_store %arg6[%c0_6, %c0_7], %7 {strides = array<i32>} : memref<8x8xf32, #tpu.memory_space<vmem>>, vector<8x8xf32>,
    %c0_i32_8 = arith.constant 0 : i32
    %9 = arith.cmpi eq, %arg2, %c0_i32_8 : i32
    %10 = arith.extui %9 : i1 to i32
    %c0_i32_9 = arith.constant 0 : i32
    %11 = arith.cmpi ne, %10, %c0_i32_9 : i32
    scf.if %11 {
      %c0_10 = arith.constant 0 : index
      %c0_11 = arith.constant 0 : index
      %12 = vector.load %arg6[%c0_10, %c0_11] : memref<8x8xf32, #tpu.memory_space<vmem>>, vector<8x8xf32>
      %cst_12 = arith.constant 4.8828125E-4 : f32
      %13 = vector.broadcast %cst_12 : f32 to vector<8x8xf32>
      %14 = arith.mulf %12, %13 : vector<8x8xf32>
      %c0_13 = arith.constant 0 : index
      %c0_14 = arith.constant 0 : index
      %15 = vector.load %arg5[%c0_13, %c0_14] : memref<8x8xf32, #tpu.memory_space<vmem>>, vector<8x8xf32>
      tpu.vector_store %arg5[%c0_13, %c0_14], %14 {strides = array<i32>} : memref<8x8xf32, #tpu.memory_space<vmem>>, vector<8x8xf32>,
    } else {
    }
    return
  }
  func.func @transform_0(%arg0: i32, %arg1: i32, %arg2: i32) -> (i32, i32) {
    %c0_i32 = arith.constant 0 : i32
    return %arg0, %arg2 : i32, i32
  }
  func.func @transform_1(%arg0: i32, %arg1: i32, %arg2: i32) -> (i32, i32) {
    %c0_i32 = arith.constant 0 : i32
    return %arg1, %arg2 : i32, i32
  }
  func.func @transform_2(%arg0: i32, %arg1: i32, %arg2: i32) -> (i32, i32) {
    %c0_i32 = arith.constant 0 : i32
    return %arg0, %arg1 : i32, i32
  }
}

</mosaic_0001>

<bundles_post_ra>
// kernel: tpu_custom_call.1
= control target key start
LH: loop header
LB: loop body
LE: loop exit
PB: predicated region body
PF: predicated region fallthrough
CT: control target
= control target key end

     0   :  { %7 = vsyncpa [#allocation4], 0  ;;  %s276_s0 = inlined_call_operand.hbm [shape: f32[8,256], index: 0, kind: input, shape index: {}]   ;;  %s277_s1 = inlined_call_operand.hbm [shape: f32[8,256], index: 1, kind: input, shape index: {}]   ;;  %s278_s2 = inlined_call_operand.hbm [shape: f32[8,8], index: 2, kind: output, shape index: {}]  }
   0x1   :  { %8 = vsyncpa [#allocation7], 0 }
   0x2   :  { %9 = vsyncpa [#allocation5], 0  ;;  %s218_s9 = smov [#allocation3]   ;;  %s219_s11 = smov [#allocation6]  }
   0x3   :  { %s16_s10 = sshll.u32 %s218_s9, 4  ;;  %s26_s12 = sshll.u32 %s219_s11, 4  ;;  %s17_s10 = int_to_ptr.vmem [resolvable:$true] %s16_s10  ;;  %s27_s12 = int_to_ptr.vmem [resolvable:$true] %s26_s12 }
   0x4   :  { %s146_s15 = scalar_lea.hbm %s276_s0, 256 }
   0x5   :  { %p147_p0 = scmp.ne.s32.totalorder %s276_s0, %s146_s15  ;;  %p150_p1 = scmp.lt.u32.totalorder %s146_s15, %s276_s0 }
   0x7   :  { %p152_p2 = pnand %p150_p1, %p147_p0 }
   0x9   :  { %155 = shalt.err (!%p152_p2)
}
   0xa   :  { %s156_s20 = scalar_lea.vmem %s17_s10, 256  ;;  %p161_p4 = scmp.lt.s32.totalorder %s17_s10, %s17_s10 }
   0xb   :  { %p157_p3 = scmp.ne.s32.totalorder %s17_s10, %s156_s20  ;;  %p162_p5 = scmp.lt.s32.totalorder %s156_s20, %s156_s20 }
   0xd   :  { %p163_p6 = por %p162_p5, %p161_p4 }
   0xf   :  { %p164_p7 = pnand %p163_p6, %p157_p3 }
  0x11   :  { %167 = shalt.err (!%p164_p7)
}
  0x12   :  { %19 = dma.hbm_to_vmem [thread:$0]  %s276_s0, 256, %s17_s10, [#allocation4]  }
  0x13   :  { %s168_s25 = scalar_lea.hbm %s277_s1, 256 }
  0x14   :  { %p169_p8 = scmp.ne.s32.totalorder %s277_s1, %s168_s25  ;;  %p172_p9 = scmp.lt.u32.totalorder %s168_s25, %s277_s1 }
  0x16   :  { %p174_p10 = pnand %p172_p9, %p169_p8 }
  0x18   :  { %177 = shalt.err (!%p174_p10)
}
  0x19   :  { %s178_s30 = scalar_lea.vmem %s27_s12, 256  ;;  %p183_p12 = scmp.lt.s32.totalorder %s27_s12, %s27_s12 }
  0x1a   :  { %p179_p11 = scmp.ne.s32.totalorder %s27_s12, %s178_s30  ;;  %p184_p13 = scmp.lt.s32.totalorder %s178_s30, %s178_s30 }
  0x1c   :  { %p185_p0 = por %p184_p13, %p183_p12 }
  0x1e   :  { %p186_p1 = pnand %p185_p0, %p179_p11 }
  0x20   :  { %189 = shalt.err (!%p186_p1)
}
  0x21   :  { %29 = dma.hbm_to_vmem [thread:$0]  %s277_s1, 256, %s27_s12, [#allocation7]  }
  0x22   :  { %212 = dma.done.wait [#allocation4], 256  }
  0x23   :  { %213 = vsyncadd [#allocation4], 4294967040 }
  0x24   :  { %214 = dma.done.wait [#allocation7], 256  }
  0x25   :  { %215 = vsyncadd [#allocation7], 4294967040  ;;  %vm40_vm0 = vcmask 64512   ;;  %v220_v0 = vmov 0.0   ;;  %v46_v1 = vld [vmem:[#allocation6 + $0x8] sm:$0xff]  ;;  %v45_v2 = vld [vmem:[#allocation6] sm:$0xff] }
  0x26   :  { %41 = vst.msk [vmem:[#allocation2] sm:$0xff] %vm40_vm0, %v220_v0  ;;  %v44_v3 = vld [vmem:[#allocation3 + $0x8] sm:$0xff]  ;;  %47 = vmatprep.subr.mxu0 %v46_v1  ;;  %v43_v4 = vld [vmem:[#allocation3] sm:$0xff]  ;;  %s221_s1 = smov [#allocation8]  }
  0x27   :  { %111 = vmatprep.mubr.f32.mxu0 %v44_v3  ;;  %48 = vmatpush1.xpose.msra.mxu0 %v45_v2  ;;  %s132_s4 = sshll.u32 %s221_s1, 4  ;;  %s133_s4 = int_to_ptr.vmem [resolvable:$true] %s132_s4 }
  0x28   :  { %s190_s5 = scalar_lea.vmem %s133_s4, 128  ;;  %p195_p3 = scmp.lt.s32.totalorder %s133_s4, %s133_s4 }
  0x29   :  { %p191_p2 = scmp.ne.s32.totalorder %s133_s4, %s190_s5  ;;  %p196_p4 = scmp.lt.s32.totalorder %s190_s5, %s190_s5 }
  0x2a   :  { %112 = vmatmul.mubr.f32.vlgmr.msra.gmra.mrb[0].mxu0 %v43_v4 }
  0x2b   :  { %p197_p5 = por %p196_p4, %p195_p3 }
  0x2d   :  { %v42_v5 = vld [vmem:[#allocation2] sm:$0xff]  ;;  %p198_p6 = pnand %p197_p5, %p191_p2 }
  0xfd   :  { %v113_v6 = vpop.f32.mrb[0].mxu0 }
  0xfe   :  { %v117_v7 = vadd.f32 %v113_v6, %v42_v5  ;;  %v115_v8 = vpop.f32.mrb[1].mxu0 }
 0x100   :  { %119 = vst.msk [vmem:[#allocation2] sm:$0xff] %vm40_vm0, %v117_v7 }
 0x107   :  { %v123_v9 = vld [vmem:[#allocation2] sm:$0xff] }
 0x108   :  { %v124_v10 = vmul.f32 0.00048828125, %v123_v9 }
 0x10a   :  { %125 = vst.msk [vmem:[#allocation8] sm:$0xff] %vm40_vm0, %v124_v10 }
 0x10b   :  { %201 = shalt.err (!%p198_p6)
}
 0x10c   :  { %s202_s8 = scalar_lea.hbm %s278_s2, 128 }
 0x10d   :  { %p203_p7 = scmp.ne.s32.totalorder %s278_s2, %s202_s8  ;;  %p206_p8 = scmp.lt.u32.totalorder %s202_s8, %s278_s2 }
 0x10f   :  { %p208_p9 = pnand %p206_p8, %p203_p7 }
 0x111   :  { %211 = shalt.err (!%p208_p9)
}
 0x112   :  { %135 = dma.vmem_to_hbm [thread:$0]  %s133_s4, 128, %s278_s2, [#allocation5]  }
 0x113   :  { %216 = dma.done.wait [#allocation5], 128  }
 0x114   :  { %217 = vsyncadd [#allocation5], 4294967168 }
 0x115   :  { %139 = vsyncpa [#allocation4], 1 }
 0x116   :  { %140 = vsyncpa [#allocation7], 1 }
 0x117   :  { %141 = vsyncpa [#allocation5], 1 }

</bundles_post_ra>
